<compile_context>
chip_gen: v7x
topology: tpu7x:2x2x1
jax: 0.10.0
libtpu: 0.0.40
codegen_flags: <defaults>
</compile_context>

<pallas_src>
from collections import namedtuple

import jax
import jax.numpy as jnp
from jax.experimental import pallas as pl
from jax.experimental.pallas import tpu as pltpu


def _make_multihead_kernel(n_heads):
    """Kernel: one shared x tile -> n_heads pointwise projections."""

    def kernel(*refs):
        x_ref = refs[0]
        w_refs = refs[1:1 + n_heads]
        b_refs = refs[1 + n_heads:1 + 2 * n_heads]
        o_refs = refs[1 + 2 * n_heads:]

        x = x_ref[...]  # (br, C) -- loaded once, reused by every head
        for w_ref, b_ref, o_ref in zip(w_refs, b_refs, o_refs):
            y = jnp.dot(x, w_ref[...].T, preferred_element_type=jnp.float32)
            o_ref[...] = (y + b_ref[...]).astype(o_ref.dtype)

    return kernel


def _pick_block_rows(rows, cap=2048):
    # Large row tiles (per-grid-step overhead amortization); cap keeps
    # double-buffered in+out tiles comfortably under the v7x 32 MiB scoped
    # VMEM even for many heads.  `cap` is a multiple of 8; if rows <= cap we
    # use the full extent (always legal w.r.t. the (8,128) rule).
    if rows <= cap:
        return rows
    return cap


def multi_headed_forward(x, heads):
    """Fused forward of MultiHeaded with 1x1-conv heads.

    x:     (N, C, H, W)
    heads: ordered mapping name -> (W (C_out, C_in), b (C_out,))
    returns namedtuple('Output', head_names) of (N, C_out_k, H, W) arrays.
    """
    names = list(heads.keys())
    n_heads = len(names)
    N, C, H, Wsp = x.shape
    rows = N * H * Wsp

    # NCHW -> channels-last 2D slab (rows, C).
    x2d = jnp.transpose(x, (0, 2, 3, 1)).reshape(rows, C)

    ws = [heads[k][0] for k in names]
    bs = [heads[k][1].reshape(1, -1) for k in names]
    couts = [int(w.shape[0]) for w in ws]

    br = _pick_block_rows(rows)
    grid = (pl.cdiv(rows, br),)  # partial last block handled by Pallas

    in_specs = [pl.BlockSpec((br, C), lambda i: (i, 0))]
    for w in ws:
        co, ci = w.shape
        in_specs.append(pl.BlockSpec((co, ci), lambda i: (0, 0)))
    for b in bs:
        in_specs.append(pl.BlockSpec(b.shape, lambda i: (0, 0)))

    out_shapes = tuple(jax.ShapeDtypeStruct((rows, co), x.dtype) for co in couts)
    out_specs = [pl.BlockSpec((br, co), lambda i: (i, 0)) for co in couts]

    itemsize = jnp.dtype(x.dtype).itemsize
    bytes_accessed = rows * C * itemsize
    flops = 0
    for co in couts:
        bytes_accessed += rows * co * itemsize + (co * C + co) * itemsize
        flops += 2 * rows * C * co

    outs = pl.pallas_call(
        _make_multihead_kernel(n_heads),
        out_shape=out_shapes,
        grid_spec=pltpu.PrefetchScalarGridSpec(
            num_scalar_prefetch=0,
            grid=grid,
            in_specs=in_specs,
            out_specs=out_specs,
        ),
        compiler_params=pltpu.CompilerParams(
            dimension_semantics=("parallel",),
        ),
        cost_estimate=pl.CostEstimate(
            flops=flops, transcendentals=0, bytes_accessed=bytes_accessed
        ),
    )(x2d, *ws, *bs)

    # (rows, C_out) -> (N, C_out, H, W) per head; pack into the namedtuple the
    # original module returns.
    result = {}
    for k, y2d, co in zip(names, outs, couts):
        result[k] = y2d.reshape(N, H, Wsp, co).transpose(0, 3, 1, 2)
    Output = namedtuple("Output", names)
    return Output(**result)


def _reference(x, heads):
    out = {}
    for k, (w, b) in heads.items():
        out[k] = jnp.einsum("nchw,oc->nohw", x, w) + b[None, :, None, None]
    return out


if __name__ == "__main__":
    # TODO(synk): heads are arbitrary torch.nn.Modules in the original;
    # here they are instantiated as 1x1-conv (pointwise linear) heads.
    key = jax.random.PRNGKey(0)
    kx, kw1, kb1, kw2, kb2 = jax.random.split(key, 5)

    N, C, H, W = 2, 4, 16, 16
    x = jax.random.normal(kx, (N, C, H, W), dtype=jnp.float32)

    heads = {
        "seg": (
            jax.random.normal(kw1, (3, C), dtype=jnp.float32) * 0.1,
            jax.random.normal(kb1, (3,), dtype=jnp.float32) * 0.1,
        ),
        "aff": (
            jax.random.normal(kw2, (6, C), dtype=jnp.float32) * 0.1,
            jax.random.normal(kb2, (6,), dtype=jnp.float32) * 0.1,
        ),
    }

    out = multi_headed_forward(x, heads)
    out = jax.block_until_ready(out)

    ref = _reference(x, heads)
    assert set(out._fields) == set(heads.keys())
    for name in heads:
        got = getattr(out, name)
        exp = ref[name]
        assert got.shape == exp.shape, (name, got.shape, exp.shape)
        assert got.dtype == exp.dtype
        assert bool(jnp.allclose(got, exp, rtol=1e-5, atol=1e-5)), name

    print("KERNEL_OK")
</pallas_src>

<mosaic_0001>
module attributes {stable_mosaic.version = 11 : i64} {
  func.func @kernel(%arg0: i32, %arg1: memref<512x4xf32, #tpu.memory_space<vmem>>, %arg2: memref<3x4xf32, #tpu.memory_space<vmem>>, %arg3: memref<6x4xf32, #tpu.memory_space<vmem>>, %arg4: memref<1x3xf32, #tpu.memory_space<vmem>>, %arg5: memref<1x6xf32, #tpu.memory_space<vmem>>, %arg6: memref<512x3xf32, #tpu.memory_space<vmem>>, %arg7: memref<512x6xf32, #tpu.memory_space<vmem>>) attributes {dimension_semantics = [#tpu.dimension_semantics<parallel>], iteration_bounds = array<i64: 1>, scalar_prefetch = 0 : i64, scratch_operands = 0 : i64, tpu.core_type = #tpu.core_type<tc>, window_params = [{transform_indices = @transform_0, window_bounds = array<i64: 512, 4>}, {pipeline_mode = #tpu.pipeline_mode<synchronous>, transform_indices = @transform_1, window_bounds = array<i64: 3, 4>}, {pipeline_mode = #tpu.pipeline_mode<synchronous>, transform_indices = @transform_2, window_bounds = array<i64: 6, 4>}, {pipeline_mode = #tpu.pipeline_mode<synchronous>, transform_indices = @transform_3, window_bounds = array<i64: 1, 3>}, {pipeline_mode = #tpu.pipeline_mode<synchronous>, transform_indices = @transform_4, window_bounds = array<i64: 1, 6>}, {transform_indices = @transform_5, window_bounds = array<i64: 512, 3>}, {transform_indices = @transform_6, window_bounds = array<i64: 512, 6>}]} {
    %c0 = arith.constant 0 : index
    %c0_0 = arith.constant 0 : index
    %0 = vector.load %arg1[%c0, %c0_0] : memref<512x4xf32, #tpu.memory_space<vmem>>, vector<512x4xf32>
    %c0_1 = arith.constant 0 : index
    %c0_2 = arith.constant 0 : index
    %1 = vector.load %arg2[%c0_1, %c0_2] : memref<3x4xf32, #tpu.memory_space<vmem>>, vector<3x4xf32>
    %2 = tpu.transpose %1, [1, 0] : vector<3x4xf32> -> vector<4x3xf32>
    %cst = arith.constant dense<0.000000e+00> : vector<512x3xf32>
    %3 = tpu.matmul %0, %2, %cst {dimension_numbers = #tpu.dot_dimension_numbers<[1], [0], [0], [1], [0, 0, 1, 1], [], []>} : vector<512x4xf32>, vector<4x3xf32>, vector<512x3xf32> -> vector<512x3xf32>
    %c0_3 = arith.constant 0 : index
    %c0_4 = arith.constant 0 : index
    %4 = vector.load %arg4[%c0_3, %c0_4] : memref<1x3xf32, #tpu.memory_space<vmem>>, vector<1x3xf32>
    %5 = vector.broadcast %4 : vector<1x3xf32> to vector<512x3xf32>
    %6 = arith.addf %3, %5 : vector<512x3xf32>
    %c0_5 = arith.constant 0 : index
    %c0_6 = arith.constant 0 : index
    %7 = vector.load %arg6[%c0_5, %c0_6] : memref<512x3xf32, #tpu.memory_space<vmem>>, vector<512x3xf32>
    tpu.vector_store %arg6[%c0_5, %c0_6], %6 {strides = array<i32>} : memref<512x3xf32, #tpu.memory_space<vmem>>, vector<512x3xf32>,
    %c0_7 = arith.constant 0 : index
    %c0_8 = arith.constant 0 : index
    %8 = vector.load %arg3[%c0_7, %c0_8] : memref<6x4xf32, #tpu.memory_space<vmem>>, vector<6x4xf32>
    %9 = tpu.transpose %8, [1, 0] : vector<6x4xf32> -> vector<4x6xf32>
    %cst_9 = arith.constant dense<0.000000e+00> : vector<512x6xf32>
    %10 = tpu.matmul %0, %9, %cst_9 {dimension_numbers = #tpu.dot_dimension_numbers<[1], [0], [0], [1], [0, 0, 1, 1], [], []>} : vector<512x4xf32>, vector<4x6xf32>, vector<512x6xf32> -> vector<512x6xf32>
    %c0_10 = arith.constant 0 : index
    %c0_11 = arith.constant 0 : index
    %11 = vector.load %arg5[%c0_10, %c0_11] : memref<1x6xf32, #tpu.memory_space<vmem>>, vector<1x6xf32>
    %12 = vector.broadcast %11 : vector<1x6xf32> to vector<512x6xf32>
    %13 = arith.addf %10, %12 : vector<512x6xf32>
    %c0_12 = arith.constant 0 : index
    %c0_13 = arith.constant 0 : index
    %14 = vector.load %arg7[%c0_12, %c0_13] : memref<512x6xf32, #tpu.memory_space<vmem>>, vector<512x6xf32>
    tpu.vector_store %arg7[%c0_12, %c0_13], %13 {strides = array<i32>} : memref<512x6xf32, #tpu.memory_space<vmem>>, vector<512x6xf32>,
    return
  }
  func.func @transform_0(%arg0: i32) -> (i32, i32) {
    %c0_i32 = arith.constant 0 : i32
    %c0_i32_0 = arith.constant 0 : i32
    return %arg0, %c0_i32 : i32, i32
  }
  func.func @transform_1(%arg0: i32) -> (i32, i32) {
    %c0_i32 = arith.constant 0 : i32
    %c0_i32_0 = arith.constant 0 : i32
    %c0_i32_1 = arith.constant 0 : i32
    return %c0_i32, %c0_i32_0 : i32, i32
  }
  func.func @transform_2(%arg0: i32) -> (i32, i32) {
    %c0_i32 = arith.constant 0 : i32
    %c0_i32_0 = arith.constant 0 : i32
    %c0_i32_1 = arith.constant 0 : i32
    return %c0_i32, %c0_i32_0 : i32, i32
  }
  func.func @transform_3(%arg0: i32) -> (i32, i32) {
    %c0_i32 = arith.constant 0 : i32
    %c0_i32_0 = arith.constant 0 : i32
    %c0_i32_1 = arith.constant 0 : i32
    return %c0_i32, %c0_i32_0 : i32, i32
  }
  func.func @transform_4(%arg0: i32) -> (i32, i32) {
    %c0_i32 = arith.constant 0 : i32
    %c0_i32_0 = arith.constant 0 : i32
    %c0_i32_1 = arith.constant 0 : i32
    return %c0_i32, %c0_i32_0 : i32, i32
  }
  func.func @transform_5(%arg0: i32) -> (i32, i32) {
    %c0_i32 = arith.constant 0 : i32
    %c0_i32_0 = arith.constant 0 : i32
    return %arg0, %c0_i32 : i32, i32
  }
  func.func @transform_6(%arg0: i32) -> (i32, i32) {
    %c0_i32 = arith.constant 0 : i32
    %c0_i32_0 = arith.constant 0 : i32
    return %arg0, %c0_i32 : i32, i32
  }
}

</mosaic_0001>

<bundles_post_ra>
// kernel: tpu_custom_call.1
= control target key start
LH: loop header
LB: loop body
LE: loop exit
PB: predicated region body
PF: predicated region fallthrough
CT: control target
= control target key end

     0   :  { %vm94_vm0 = vcmask 31744   ;;  %vm675_vm1 = vcmask 23552   ;;  %vm1136_vm2 = vcmask 48128   ;;  %s2682_s1 = inlined_call_operand.vmem [shape: f32[3,4], index: 1, kind: input, shape index: {}]   ;;  %s2683_s2 = inlined_call_operand.vmem [shape: f32[6,4], index: 2, kind: input, shape index: {}]   ;;  %s2684_s0 = inlined_call_operand.vmem [shape: f32[512,4], index: 0, kind: input, shape index: {}]   ;;  %s2685_s3 = inlined_call_operand.vmem [shape: f32[1,3], index: 3, kind: input, shape index: {}]   ;;  %s2686_s4 = inlined_call_operand.vmem [shape: f32[1,6], index: 4, kind: input, shape index: {}]   ;;  %s2687_s5 = inlined_call_operand.vmem [shape: f32[512,3], index: 5, kind: output, shape index: {0}]   ;;  %s2688_s6 = inlined_call_operand.vmem [shape: f32[512,6], index: 6, kind: output, shape index: {1}]  }
   0x1   :  { %v86_v0 = vld [vmem:[%s2682_s1] sm:$0x7]  ;;  %v23_v3 = vld [vmem:[%s2684_s0 + $0x8] sm:$0xff]  ;;  %v24_v4 = vld [vmem:[%s2684_s0 + $0x10] sm:$0xff] }
   0x2   :  { %v740_v1 = vld [vmem:[%s2683_s2] sm:$0x3f]  ;;  %1471 = vmatprep.subr.msk.mxu0 %vm94_vm0, %v86_v0  ;;  %v25_v5 = vld [vmem:[%s2684_s0 + $0x18] sm:$0xff]  ;;  %v27_v7 = vld [vmem:[%s2684_s0 + $0x28] sm:$0xff] }
   0x3   :  { %v22_v2 = vld [vmem:[%s2684_s0] sm:$0xff]  ;;  %1569 = vmatprep.subr.msk.mxu1 %vm94_vm0, %v740_v1  ;;  %1472 = vmatpush3.xpose.msk.msra.mxu0 %vm94_vm0, %v86_v0  ;;  %v28_v8 = vld [vmem:[%s2684_s0 + $0x30] sm:$0xff]  ;;  %v29_v9 = vld [vmem:[%s2684_s0 + $0x38] sm:$0xff] }
   0x4   :  { %1570 = vmatpush3.xpose.msk.msra.mxu1 %vm94_vm0, %v740_v1  ;;  %1473 = vmatprep.mubr.msk.f32.mxu0 %vm94_vm0, %v22_v2  ;;  %v26_v6 = vld [vmem:[%s2684_s0 + $0x20] sm:$0xff]  ;;  %v31_v11 = vld [vmem:[%s2684_s0 + $0x48] sm:$0xff]  ;;  %v32_v12 = vld [vmem:[%s2684_s0 + $0x50] sm:$0xff] }
   0x5   :  { %1571 = vmatprep.mubr.msk.f32.mxu1 %vm94_vm0, %v22_v2  ;;  %v30_v10 = vld [vmem:[%s2684_s0 + $0x40] sm:$0xff]  ;;  %v33_v13 = vld [vmem:[%s2684_s0 + $0x58] sm:$0xff]  ;;  %v35_v15 = vld [vmem:[%s2684_s0 + $0x68] sm:$0xff] }
   0x6   :  { %1474 = vmatmul.mubr.msk.f32.vlgmr.msra.gmra.mrb[0].mxu0 %vm94_vm0, %v23_v3  ;;  %v34_v14 = vld [vmem:[%s2684_s0 + $0x60] sm:$0xff]  ;;  %v36_v16 = vld [vmem:[%s2684_s0 + $0x70] sm:$0xff]  ;;  %v37_v17 = vld [vmem:[%s2684_s0 + $0x78] sm:$0xff] }
   0x7   :  { %1572 = vmatmul.mubr.msk.f32.vlgmr.msra.gmra.mrb[0].mxu1 %vm94_vm0, %v23_v3  ;;  %1476 = vmatprep.mubr.msk.f32.mxu0 %vm94_vm0, %v24_v4  ;;  %v38_v18 = vld [vmem:[%s2684_s0 + $0x80] sm:$0xff]  ;;  %v39_v19 = vld [vmem:[%s2684_s0 + $0x88] sm:$0xff]  ;;  %v40_v20 = vld [vmem:[%s2684_s0 + $0x90] sm:$0xff] }
   0x8   :  { %1574 = vmatprep.mubr.msk.f32.mxu1 %vm94_vm0, %v24_v4  ;;  %v41_v21 = vld [vmem:[%s2684_s0 + $0x98] sm:$0xff]  ;;  %v42_v22 = vld [vmem:[%s2684_s0 + $0xa0] sm:$0xff]  ;;  %v43_v23 = vld [vmem:[%s2684_s0 + $0xa8] sm:$0xff] }
   0x9   :  { %v44_v24 = vld [vmem:[%s2684_s0 + $0xb0] sm:$0xff]  ;;  %v45_v25 = vld [vmem:[%s2684_s0 + $0xb8] sm:$0xff]  ;;  %v46_v26 = vld [vmem:[%s2684_s0 + $0xc0] sm:$0xff] }
   0xa   :  { %1477 = vmatmul.mubr.msk.f32.gmra.mrb[2].mxu0 %vm94_vm0, %v25_v5  ;;  %v47_v27 = vld [vmem:[%s2684_s0 + $0xc8] sm:$0xff]  ;;  %v48_v28 = vld [vmem:[%s2684_s0 + $0xd0] sm:$0xff]  ;;  %v49_v29 = vld [vmem:[%s2684_s0 + $0xd8] sm:$0xff] }
   0xb   :  { %1575 = vmatmul.mubr.msk.f32.gmra.mrb[2].mxu1 %vm94_vm0, %v25_v5  ;;  %1479 = vmatprep.mubr.msk.f32.mxu0 %vm94_vm0, %v26_v6  ;;  %v50_v30 = vld [vmem:[%s2684_s0 + $0xe0] sm:$0xff]  ;;  %v51_v31 = vld [vmem:[%s2684_s0 + $0xe8] sm:$0xff]  ;;  %v52_v32 = vld [vmem:[%s2684_s0 + $0xf0] sm:$0xff] }
   0xc   :  { %1577 = vmatprep.mubr.msk.f32.mxu1 %vm94_vm0, %v26_v6  ;;  %v53_v33 = vld [vmem:[%s2684_s0 + $0xf8] sm:$0xff]  ;;  %v54_v34 = vld [vmem:[%s2684_s0 + $0x100] sm:$0xff]  ;;  %v55_v35 = vld [vmem:[%s2684_s0 + $0x108] sm:$0xff] }
   0xd   :  { %v56_v36 = vld [vmem:[%s2684_s0 + $0x110] sm:$0xff]  ;;  %v57_v37 = vld [vmem:[%s2684_s0 + $0x118] sm:$0xff]  ;;  %v58_v38 = vld [vmem:[%s2684_s0 + $0x120] sm:$0xff] }
   0xe   :  { %1480 = vmatmul.mubr.msk.f32.gmra.mrb[4].mxu0 %vm94_vm0, %v27_v7  ;;  %v59_v39 = vld [vmem:[%s2684_s0 + $0x128] sm:$0xff]  ;;  %v60_v40 = vld [vmem:[%s2684_s0 + $0x130] sm:$0xff]  ;;  %v61_v41 = vld [vmem:[%s2684_s0 + $0x138] sm:$0xff] }
   0xf   :  { %1578 = vmatmul.mubr.msk.f32.gmra.mrb[4].mxu1 %vm94_vm0, %v27_v7  ;;  %1482 = vmatprep.mubr.msk.f32.mxu0 %vm94_vm0, %v28_v8  ;;  %v62_v42 = vld [vmem:[%s2684_s0 + $0x140] sm:$0xff]  ;;  %v63_v43 = vld [vmem:[%s2684_s0 + $0x148] sm:$0xff]  ;;  %v64_v44 = vld [vmem:[%s2684_s0 + $0x150] sm:$0xff] }
  0x10   :  { %1580 = vmatprep.mubr.msk.f32.mxu1 %vm94_vm0, %v28_v8  ;;  %v65_v45 = vld [vmem:[%s2684_s0 + $0x158] sm:$0xff]  ;;  %v66_v46 = vld [vmem:[%s2684_s0 + $0x160] sm:$0xff]  ;;  %v67_v47 = vld [vmem:[%s2684_s0 + $0x168] sm:$0xff] }
  0x11   :  { %v68_v48 = vld [vmem:[%s2684_s0 + $0x170] sm:$0xff]  ;;  %v69_v49 = vld [vmem:[%s2684_s0 + $0x178] sm:$0xff]  ;;  %v70_v50 = vld [vmem:[%s2684_s0 + $0x180] sm:$0xff] }
  0x12   :  { %1483 = vmatmul.mubr.msk.f32.gmra.mrb[6].mxu0 %vm94_vm0, %v29_v9  ;;  %v71_v51 = vld [vmem:[%s2684_s0 + $0x188] sm:$0xff]  ;;  %v72_v52 = vld [vmem:[%s2684_s0 + $0x190] sm:$0xff]  ;;  %v73_v53 = vld [vmem:[%s2684_s0 + $0x198] sm:$0xff] }
  0x13   :  { %1581 = vmatmul.mubr.msk.f32.gmra.mrb[6].mxu1 %vm94_vm0, %v29_v9  ;;  %1485 = vmatprep.mubr.msk.f32.mxu0 %vm94_vm0, %v30_v10  ;;  %v74_v54 = vld [vmem:[%s2684_s0 + $0x1a0] sm:$0xff]  ;;  %v75_v55 = vld [vmem:[%s2684_s0 + $0x1a8] sm:$0xff]  ;;  %v76_v56 = vld [vmem:[%s2684_s0 + $0x1b0] sm:$0xff] }
  0x14   :  { %1583 = vmatprep.mubr.msk.f32.mxu1 %vm94_vm0, %v30_v10  ;;  %v77_v57 = vld [vmem:[%s2684_s0 + $0x1b8] sm:$0xff]  ;;  %v78_v58 = vld [vmem:[%s2684_s0 + $0x1c0] sm:$0xff]  ;;  %v79_v59 = vld [vmem:[%s2684_s0 + $0x1c8] sm:$0xff] }
  0x15   :  { %v80_v60 = vld [vmem:[%s2684_s0 + $0x1d0] sm:$0xff]  ;;  %v81_v61 = vld [vmem:[%s2684_s0 + $0x1d8] sm:$0xff]  ;;  %v82_v62 = vld [vmem:[%s2684_s0 + $0x1e0] sm:$0xff] }
  0x16   :  { %1486 = vmatmul.mubr.msk.f32.gmra.mrb[8].mxu0 %vm94_vm0, %v31_v11  ;;  %v83_v63 = vld [vmem:[%s2684_s0 + $0x1e8] sm:$0xff]  ;;  %v84_v0 = vld [vmem:[%s2684_s0 + $0x1f0] sm:$0xff]  ;;  %v85_v1 = vld [vmem:[%s2684_s0 + $0x1f8] sm:$0xff] }
  0x17   :  { %1584 = vmatmul.mubr.msk.f32.gmra.mrb[8].mxu1 %vm94_vm0, %v31_v11  ;;  %1488 = vmatprep.mubr.msk.f32.mxu0 %vm94_vm0, %v32_v12  ;;  %v2035_v2 = vld [vmem:[%s2685_s3] ss:$0 sm:$0xff] }
  0x18   :  { %1586 = vmatprep.mubr.msk.f32.mxu1 %vm94_vm0, %v32_v12  ;;  %v2040_v3 = vld [vmem:[%s2686_s4] ss:$0 sm:$0xff] }
  0x1a   :  { %1489 = vmatmul.mubr.msk.f32.gmra.mrb[10].mxu0 %vm94_vm0, %v33_v13 }
  0x1b   :  { %1587 = vmatmul.mubr.msk.f32.gmra.mrb[10].mxu1 %vm94_vm0, %v33_v13  ;;  %1491 = vmatprep.mubr.msk.f32.mxu0 %vm94_vm0, %v34_v14 }
  0x1c   :  { %1589 = vmatprep.mubr.msk.f32.mxu1 %vm94_vm0, %v34_v14 }
  0x1e   :  { %1492 = vmatmul.mubr.msk.f32.gmra.mrb[12].mxu0 %vm94_vm0, %v35_v15 }
  0x1f   :  { %1590 = vmatmul.mubr.msk.f32.gmra.mrb[12].mxu1 %vm94_vm0, %v35_v15  ;;  %1494 = vmatprep.mubr.msk.f32.mxu0 %vm94_vm0, %v36_v16 }
  0x20   :  { %1592 = vmatprep.mubr.msk.f32.mxu1 %vm94_vm0, %v36_v16 }
  0x22   :  { %1495 = vmatmul.mubr.msk.f32.gmra.mrb[14].mxu0 %vm94_vm0, %v37_v17 }
  0x23   :  { %1593 = vmatmul.mubr.msk.f32.gmra.mrb[14].mxu1 %vm94_vm0, %v37_v17  ;;  %1497 = vmatprep.mubr.msk.f32.mxu0 %vm94_vm0, %v38_v18 }
  0x24   :  { %1595 = vmatprep.mubr.msk.f32.mxu1 %vm94_vm0, %v38_v18 }
  0x26   :  { %1498 = vmatmul.mubr.msk.f32.gmra.mrb[16].mxu0 %vm94_vm0, %v39_v19 }
  0x27   :  { %1596 = vmatmul.mubr.msk.f32.gmra.mrb[16].mxu1 %vm94_vm0, %v39_v19  ;;  %1500 = vmatprep.mubr.msk.f32.mxu0 %vm94_vm0, %v40_v20 }
  0x28   :  { %1598 = vmatprep.mubr.msk.f32.mxu1 %vm94_vm0, %v40_v20 }
  0x2a   :  { %1501 = vmatmul.mubr.msk.f32.gmra.mrb[18].mxu0 %vm94_vm0, %v41_v21 }
  0x2b   :  { %1599 = vmatmul.mubr.msk.f32.gmra.mrb[18].mxu1 %vm94_vm0, %v41_v21  ;;  %1503 = vmatprep.mubr.msk.f32.mxu0 %vm94_vm0, %v42_v22 }
  0x2c   :  { %1601 = vmatprep.mubr.msk.f32.mxu1 %vm94_vm0, %v42_v22 }
  0x2e   :  { %1504 = vmatmul.mubr.msk.f32.gmra.mrb[20].mxu0 %vm94_vm0, %v43_v23 }
  0x2f   :  { %1602 = vmatmul.mubr.msk.f32.gmra.mrb[20].mxu1 %vm94_vm0, %v43_v23  ;;  %1506 = vmatprep.mubr.msk.f32.mxu0 %vm94_vm0, %v44_v24 }
  0x30   :  { %1604 = vmatprep.mubr.msk.f32.mxu1 %vm94_vm0, %v44_v24 }
  0x32   :  { %1507 = vmatmul.mubr.msk.f32.gmra.mrb[22].mxu0 %vm94_vm0, %v45_v25 }
  0x33   :  { %1605 = vmatmul.mubr.msk.f32.gmra.mrb[22].mxu1 %vm94_vm0, %v45_v25  ;;  %1509 = vmatprep.mubr.msk.f32.mxu0 %vm94_vm0, %v46_v26 }
  0x34   :  { %1607 = vmatprep.mubr.msk.f32.mxu1 %vm94_vm0, %v46_v26 }
  0x36   :  { %1510 = vmatmul.mubr.msk.f32.gmra.mrb[24].mxu0 %vm94_vm0, %v47_v27 }
  0x37   :  { %1608 = vmatmul.mubr.msk.f32.gmra.mrb[24].mxu1 %vm94_vm0, %v47_v27  ;;  %1512 = vmatprep.mubr.msk.f32.mxu0 %vm94_vm0, %v48_v28 }
  0x38   :  { %1610 = vmatprep.mubr.msk.f32.mxu1 %vm94_vm0, %v48_v28 }
  0x3a   :  { %1513 = vmatmul.mubr.msk.f32.gmra.mrb[26].mxu0 %vm94_vm0, %v49_v29 }
  0x3b   :  { %1611 = vmatmul.mubr.msk.f32.gmra.mrb[26].mxu1 %vm94_vm0, %v49_v29  ;;  %1515 = vmatprep.mubr.msk.f32.mxu0 %vm94_vm0, %v50_v30 }
  0x3c   :  { %1613 = vmatprep.mubr.msk.f32.mxu1 %vm94_vm0, %v50_v30 }
  0x3e   :  { %1516 = vmatmul.mubr.msk.f32.gmra.mrb[28].mxu0 %vm94_vm0, %v51_v31 }
  0x3f   :  { %1614 = vmatmul.mubr.msk.f32.gmra.mrb[28].mxu1 %vm94_vm0, %v51_v31  ;;  %1518 = vmatprep.mubr.msk.f32.mxu0 %vm94_vm0, %v52_v32 }
  0x40   :  { %1616 = vmatprep.mubr.msk.f32.mxu1 %vm94_vm0, %v52_v32 }
  0x42   :  { %1519 = vmatmul.mubr.msk.f32.gmra.mrb[30].mxu0 %vm94_vm0, %v53_v33 }
  0x43   :  { %1617 = vmatmul.mubr.msk.f32.gmra.mrb[30].mxu1 %vm94_vm0, %v53_v33  ;;  %1521 = vmatprep.mubr.msk.f32.mxu0 %vm94_vm0, %v54_v34 }
  0x44   :  { %1619 = vmatprep.mubr.msk.f32.mxu1 %vm94_vm0, %v54_v34 }
  0x46   :  { %1522 = vmatmul.mubr.msk.f32.gmra.mrb[32].mxu0 %vm94_vm0, %v55_v35 }
  0x47   :  { %1620 = vmatmul.mubr.msk.f32.gmra.mrb[32].mxu1 %vm94_vm0, %v55_v35  ;;  %1524 = vmatprep.mubr.msk.f32.mxu0 %vm94_vm0, %v56_v36 }
  0x48   :  { %1622 = vmatprep.mubr.msk.f32.mxu1 %vm94_vm0, %v56_v36 }
  0x4a   :  { %1525 = vmatmul.mubr.msk.f32.gmra.mrb[34].mxu0 %vm94_vm0, %v57_v37 }
  0x4b   :  { %1623 = vmatmul.mubr.msk.f32.gmra.mrb[34].mxu1 %vm94_vm0, %v57_v37  ;;  %1527 = vmatprep.mubr.msk.f32.mxu0 %vm94_vm0, %v58_v38 }
  0x4c   :  { %1625 = vmatprep.mubr.msk.f32.mxu1 %vm94_vm0, %v58_v38 }
  0x4e   :  { %1528 = vmatmul.mubr.msk.f32.gmra.mrb[36].mxu0 %vm94_vm0, %v59_v39 }
  0x4f   :  { %1626 = vmatmul.mubr.msk.f32.gmra.mrb[36].mxu1 %vm94_vm0, %v59_v39  ;;  %1530 = vmatprep.mubr.msk.f32.mxu0 %vm94_vm0, %v60_v40 }
  0x50   :  { %1628 = vmatprep.mubr.msk.f32.mxu1 %vm94_vm0, %v60_v40 }
  0x52   :  { %1531 = vmatmul.mubr.msk.f32.gmra.mrb[38].mxu0 %vm94_vm0, %v61_v41 }
  0x53   :  { %1629 = vmatmul.mubr.msk.f32.gmra.mrb[38].mxu1 %vm94_vm0, %v61_v41  ;;  %1533 = vmatprep.mubr.msk.f32.mxu0 %vm94_vm0, %v62_v42 }
  0x54   :  { %1631 = vmatprep.mubr.msk.f32.mxu1 %vm94_vm0, %v62_v42 }
  0x56   :  { %1534 = vmatmul.mubr.msk.f32.gmra.mrb[40].mxu0 %vm94_vm0, %v63_v43 }
  0x57   :  { %1632 = vmatmul.mubr.msk.f32.gmra.mrb[40].mxu1 %vm94_vm0, %v63_v43  ;;  %1536 = vmatprep.mubr.msk.f32.mxu0 %vm94_vm0, %v64_v44 }
  0x58   :  { %1634 = vmatprep.mubr.msk.f32.mxu1 %vm94_vm0, %v64_v44 }
  0x5a   :  { %1537 = vmatmul.mubr.msk.f32.gmra.mrb[42].mxu0 %vm94_vm0, %v65_v45 }
  0x5b   :  { %1635 = vmatmul.mubr.msk.f32.gmra.mrb[42].mxu1 %vm94_vm0, %v65_v45  ;;  %1539 = vmatprep.mubr.msk.f32.mxu0 %vm94_vm0, %v66_v46 }
  0x5c   :  { %1637 = vmatprep.mubr.msk.f32.mxu1 %vm94_vm0, %v66_v46 }
  0x5e   :  { %1540 = vmatmul.mubr.msk.f32.gmra.mrb[44].mxu0 %vm94_vm0, %v67_v47 }
  0x5f   :  { %1638 = vmatmul.mubr.msk.f32.gmra.mrb[44].mxu1 %vm94_vm0, %v67_v47  ;;  %1542 = vmatprep.mubr.msk.f32.mxu0 %vm94_vm0, %v68_v48 }
  0x60   :  { %1640 = vmatprep.mubr.msk.f32.mxu1 %vm94_vm0, %v68_v48 }
  0x62   :  { %1543 = vmatmul.mubr.msk.f32.gmra.mrb[46].mxu0 %vm94_vm0, %v69_v49 }
  0x63   :  { %1641 = vmatmul.mubr.msk.f32.gmra.mrb[46].mxu1 %vm94_vm0, %v69_v49  ;;  %1545 = vmatprep.mubr.msk.f32.mxu0 %vm94_vm0, %v70_v50 }
  0x64   :  { %1643 = vmatprep.mubr.msk.f32.mxu1 %vm94_vm0, %v70_v50 }
  0x66   :  { %1546 = vmatmul.mubr.msk.f32.gmra.mrb[48].mxu0 %vm94_vm0, %v71_v51 }
  0x67   :  { %1644 = vmatmul.mubr.msk.f32.gmra.mrb[48].mxu1 %vm94_vm0, %v71_v51  ;;  %1548 = vmatprep.mubr.msk.f32.mxu0 %vm94_vm0, %v72_v52 }
  0x68   :  { %1646 = vmatprep.mubr.msk.f32.mxu1 %vm94_vm0, %v72_v52 }
  0x6a   :  { %1549 = vmatmul.mubr.msk.f32.gmra.mrb[50].mxu0 %vm94_vm0, %v73_v53 }
  0x6b   :  { %1647 = vmatmul.mubr.msk.f32.gmra.mrb[50].mxu1 %vm94_vm0, %v73_v53  ;;  %1551 = vmatprep.mubr.msk.f32.mxu0 %vm94_vm0, %v74_v54 }
  0x6c   :  { %1649 = vmatprep.mubr.msk.f32.mxu1 %vm94_vm0, %v74_v54 }
  0x6e   :  { %1552 = vmatmul.mubr.msk.f32.gmra.mrb[52].mxu0 %vm94_vm0, %v75_v55 }
  0x6f   :  { %1650 = vmatmul.mubr.msk.f32.gmra.mrb[52].mxu1 %vm94_vm0, %v75_v55  ;;  %1554 = vmatprep.mubr.msk.f32.mxu0 %vm94_vm0, %v76_v56 }
  0x70   :  { %1652 = vmatprep.mubr.msk.f32.mxu1 %vm94_vm0, %v76_v56 }
  0x72   :  { %1555 = vmatmul.mubr.msk.f32.gmra.mrb[54].mxu0 %vm94_vm0, %v77_v57 }
  0x73   :  { %1653 = vmatmul.mubr.msk.f32.gmra.mrb[54].mxu1 %vm94_vm0, %v77_v57  ;;  %1557 = vmatprep.mubr.msk.f32.mxu0 %vm94_vm0, %v78_v58 }
  0x74   :  { %1655 = vmatprep.mubr.msk.f32.mxu1 %vm94_vm0, %v78_v58 }
  0x76   :  { %1558 = vmatmul.mubr.msk.f32.gmra.mrb[56].mxu0 %vm94_vm0, %v79_v59 }
  0x77   :  { %1656 = vmatmul.mubr.msk.f32.gmra.mrb[56].mxu1 %vm94_vm0, %v79_v59  ;;  %1560 = vmatprep.mubr.msk.f32.mxu0 %vm94_vm0, %v80_v60 }
  0x78   :  { %1658 = vmatprep.mubr.msk.f32.mxu1 %vm94_vm0, %v80_v60 }
  0x7a   :  { %1561 = vmatmul.mubr.msk.f32.gmra.mrb[58].mxu0 %vm94_vm0, %v81_v61 }
  0x7b   :  { %1659 = vmatmul.mubr.msk.f32.gmra.mrb[58].mxu1 %vm94_vm0, %v81_v61  ;;  %1563 = vmatprep.mubr.msk.f32.mxu0 %vm94_vm0, %v82_v62 }
  0x7c   :  { %1661 = vmatprep.mubr.msk.f32.mxu1 %vm94_vm0, %v82_v62 }
  0x7e   :  { %1564 = vmatmul.mubr.msk.f32.gmra.mrb[60].mxu0 %vm94_vm0, %v83_v63 }
  0x7f   :  { %1662 = vmatmul.mubr.msk.f32.gmra.mrb[60].mxu1 %vm94_vm0, %v83_v63  ;;  %1566 = vmatprep.mubr.msk.f32.mxu0 %vm94_vm0, %v84_v0 }
  0x80   :  { %1664 = vmatprep.mubr.msk.f32.mxu1 %vm94_vm0, %v84_v0 }
  0x82   :  { %1567 = vmatmul.mubr.msk.f32.gmra.mrb[62].mxu0 %vm94_vm0, %v85_v1 }
  0x83   :  { %1665 = vmatmul.mubr.msk.f32.gmra.mrb[62].mxu1 %vm94_vm0, %v85_v1 }
  0xd9   :  { %v1475_v4 = vpop.f32.mrb[0].mxu0 }
  0xda   :  { %v1573_v5 = vpop.f32.mrb[0].mxu1  ;;  %v362_v6 = vadd.f32 %v1475_v4, %v2035_v2  ;;  %v356_v8 = vpop.f32.mrb[1].mxu0 }
  0xdb   :  { %v823_v7 = vadd.f32 %v1573_v5, %v2040_v3  ;;  %v817_v9 = vpop.f32.mrb[1].mxu1  ;;  %v357_v10 = vadd.f32 %v2035_v2, %v356_v8 }
  0xdc   :  { %v818_v11 = vadd.f32 %v2040_v3, %v817_v9  ;;  %677 = vst.msk [vmem:[%s2687_s5 + $0x8] sm:$0xff] %vm675_vm1, %v362_v6 }
  0xdd   :  { %1138 = vst.msk [vmem:[%s2688_s6 + $0x8] sm:$0xff] %vm1136_vm2, %v823_v7  ;;  %v1478_v12 = vpop.f32.mrb[2].mxu0 }
  0xde   :  { %676 = vst.msk [vmem:[%s2687_s5] sm:$0xff] %vm675_vm1, %v357_v10  ;;  %v1576_v13 = vpop.f32.mrb[2].mxu1  ;;  %v372_v14 = vadd.f32 %v1478_v12, %v2035_v2  ;;  %v366_v16 = vpop.f32.mrb[3].mxu0 }
  0xdf   :  { %1137 = vst.msk [vmem:[%s2688_s6] sm:$0xff] %vm1136_vm2, %v818_v11  ;;  %v833_v15 = vadd.f32 %v1576_v13, %v2040_v3  ;;  %v827_v17 = vpop.f32.mrb[3].mxu1  ;;  %v367_v18 = vadd.f32 %v2035_v2, %v366_v16 }
  0xe0   :  { %v828_v19 = vadd.f32 %v2040_v3, %v827_v17  ;;  %679 = vst.msk [vmem:[%s2687_s5 + $0x18] sm:$0xff] %vm675_vm1, %v372_v14 }
  0xe1   :  { %1140 = vst.msk [vmem:[%s2688_s6 + $0x18] sm:$0xff] %vm1136_vm2, %v833_v15  ;;  %v1481_v20 = vpop.f32.mrb[4].mxu0 }
  0xe2   :  { %678 = vst.msk [vmem:[%s2687_s5 + $0x10] sm:$0xff] %vm675_vm1, %v367_v18  ;;  %v1579_v21 = vpop.f32.mrb[4].mxu1  ;;  %v382_v22 = vadd.f32 %v1481_v20, %v2035_v2  ;;  %v376_v24 = vpop.f32.mrb[5].mxu0 }
  0xe3   :  { %1139 = vst.msk [vmem:[%s2688_s6 + $0x10] sm:$0xff] %vm1136_vm2, %v828_v19  ;;  %v843_v23 = vadd.f32 %v1579_v21, %v2040_v3  ;;  %v837_v25 = vpop.f32.mrb[5].mxu1  ;;  %v377_v26 = vadd.f32 %v2035_v2, %v376_v24 }
  0xe4   :  { %v838_v27 = vadd.f32 %v2040_v3, %v837_v25  ;;  %681 = vst.msk [vmem:[%s2687_s5 + $0x28] sm:$0xff] %vm675_vm1, %v382_v22 }
  0xe5   :  { %1142 = vst.msk [vmem:[%s2688_s6 + $0x28] sm:$0xff] %vm1136_vm2, %v843_v23  ;;  %v1484_v28 = vpop.f32.mrb[6].mxu0 }
  0xe6   :  { %680 = vst.msk [vmem:[%s2687_s5 + $0x20] sm:$0xff] %vm675_vm1, %v377_v26  ;;  %v1582_v29 = vpop.f32.mrb[6].mxu1  ;;  %v392_v30 = vadd.f32 %v1484_v28, %v2035_v2  ;;  %v386_v32 = vpop.f32.mrb[7].mxu0 }
  0xe7   :  { %1141 = vst.msk [vmem:[%s2688_s6 + $0x20] sm:$0xff] %vm1136_vm2, %v838_v27  ;;  %v853_v31 = vadd.f32 %v1582_v29, %v2040_v3  ;;  %v847_v33 = vpop.f32.mrb[7].mxu1  ;;  %v387_v34 = vadd.f32 %v2035_v2, %v386_v32 }
  0xe8   :  { %v848_v35 = vadd.f32 %v2040_v3, %v847_v33  ;;  %683 = vst.msk [vmem:[%s2687_s5 + $0x38] sm:$0xff] %vm675_vm1, %v392_v30 }
  0xe9   :  { %1144 = vst.msk [vmem:[%s2688_s6 + $0x38] sm:$0xff] %vm1136_vm2, %v853_v31  ;;  %v1487_v36 = vpop.f32.mrb[8].mxu0 }
  0xea   :  { %682 = vst.msk [vmem:[%s2687_s5 + $0x30] sm:$0xff] %vm675_vm1, %v387_v34  ;;  %v1585_v37 = vpop.f32.mrb[8].mxu1  ;;  %v402_v38 = vadd.f32 %v1487_v36, %v2035_v2  ;;  %v396_v40 = vpop.f32.mrb[9].mxu0 }
  0xeb   :  { %1143 = vst.msk [vmem:[%s2688_s6 + $0x30] sm:$0xff] %vm1136_vm2, %v848_v35  ;;  %v863_v39 = vadd.f32 %v1585_v37, %v2040_v3  ;;  %v857_v41 = vpop.f32.mrb[9].mxu1  ;;  %v397_v42 = vadd.f32 %v2035_v2, %v396_v40 }
  0xec   :  { %v858_v43 = vadd.f32 %v2040_v3, %v857_v41  ;;  %685 = vst.msk [vmem:[%s2687_s5 + $0x48] sm:$0xff] %vm675_vm1, %v402_v38 }
  0xed   :  { %1146 = vst.msk [vmem:[%s2688_s6 + $0x48] sm:$0xff] %vm1136_vm2, %v863_v39  ;;  %v1490_v44 = vpop.f32.mrb[10].mxu0 }
  0xee   :  { %684 = vst.msk [vmem:[%s2687_s5 + $0x40] sm:$0xff] %vm675_vm1, %v397_v42  ;;  %v1588_v45 = vpop.f32.mrb[10].mxu1  ;;  %v412_v46 = vadd.f32 %v1490_v44, %v2035_v2  ;;  %v406_v48 = vpop.f32.mrb[11].mxu0 }
  0xef   :  { %1145 = vst.msk [vmem:[%s2688_s6 + $0x40] sm:$0xff] %vm1136_vm2, %v858_v43  ;;  %v873_v47 = vadd.f32 %v1588_v45, %v2040_v3  ;;  %v867_v49 = vpop.f32.mrb[11].mxu1  ;;  %v407_v50 = vadd.f32 %v2035_v2, %v406_v48 }
  0xf0   :  { %v868_v51 = vadd.f32 %v2040_v3, %v867_v49  ;;  %687 = vst.msk [vmem:[%s2687_s5 + $0x58] sm:$0xff] %vm675_vm1, %v412_v46 }
  0xf1   :  { %1148 = vst.msk [vmem:[%s2688_s6 + $0x58] sm:$0xff] %vm1136_vm2, %v873_v47  ;;  %v1493_v52 = vpop.f32.mrb[12].mxu0 }
  0xf2   :  { %686 = vst.msk [vmem:[%s2687_s5 + $0x50] sm:$0xff] %vm675_vm1, %v407_v50  ;;  %v1591_v53 = vpop.f32.mrb[12].mxu1  ;;  %v422_v54 = vadd.f32 %v1493_v52, %v2035_v2  ;;  %v416_v56 = vpop.f32.mrb[13].mxu0 }
  0xf3   :  { %1147 = vst.msk [vmem:[%s2688_s6 + $0x50] sm:$0xff] %vm1136_vm2, %v868_v51  ;;  %v883_v55 = vadd.f32 %v1591_v53, %v2040_v3  ;;  %v877_v57 = vpop.f32.mrb[13].mxu1  ;;  %v417_v58 = vadd.f32 %v2035_v2, %v416_v56 }
  0xf4   :  { %v878_v59 = vadd.f32 %v2040_v3, %v877_v57  ;;  %689 = vst.msk [vmem:[%s2687_s5 + $0x68] sm:$0xff] %vm675_vm1, %v422_v54 }
  0xf5   :  { %1150 = vst.msk [vmem:[%s2688_s6 + $0x68] sm:$0xff] %vm1136_vm2, %v883_v55  ;;  %v1496_v60 = vpop.f32.mrb[14].mxu0 }
  0xf6   :  { %688 = vst.msk [vmem:[%s2687_s5 + $0x60] sm:$0xff] %vm675_vm1, %v417_v58  ;;  %v1594_v61 = vpop.f32.mrb[14].mxu1  ;;  %v432_v62 = vadd.f32 %v1496_v60, %v2035_v2  ;;  %v426_v0 = vpop.f32.mrb[15].mxu0 }
  0xf7   :  { %1149 = vst.msk [vmem:[%s2688_s6 + $0x60] sm:$0xff] %vm1136_vm2, %v878_v59  ;;  %v893_v63 = vadd.f32 %v1594_v61, %v2040_v3  ;;  %v887_v1 = vpop.f32.mrb[15].mxu1  ;;  %v427_v4 = vadd.f32 %v2035_v2, %v426_v0 }
  0xf8   :  { %v888_v5 = vadd.f32 %v2040_v3, %v887_v1  ;;  %691 = vst.msk [vmem:[%s2687_s5 + $0x78] sm:$0xff] %vm675_vm1, %v432_v62 }
  0xf9   :  { %1152 = vst.msk [vmem:[%s2688_s6 + $0x78] sm:$0xff] %vm1136_vm2, %v893_v63  ;;  %v1499_v6 = vpop.f32.mrb[16].mxu0 }
  0xfa   :  { %690 = vst.msk [vmem:[%s2687_s5 + $0x70] sm:$0xff] %vm675_vm1, %v427_v4  ;;  %v1597_v7 = vpop.f32.mrb[16].mxu1  ;;  %v442_v8 = vadd.f32 %v1499_v6, %v2035_v2  ;;  %v436_v10 = vpop.f32.mrb[17].mxu0 }
  0xfb   :  { %1151 = vst.msk [vmem:[%s2688_s6 + $0x70] sm:$0xff] %vm1136_vm2, %v888_v5  ;;  %v903_v9 = vadd.f32 %v1597_v7, %v2040_v3  ;;  %v897_v11 = vpop.f32.mrb[17].mxu1  ;;  %v437_v12 = vadd.f32 %v2035_v2, %v436_v10 }
  0xfc   :  { %v898_v13 = vadd.f32 %v2040_v3, %v897_v11  ;;  %693 = vst.msk [vmem:[%s2687_s5 + $0x88] sm:$0xff] %vm675_vm1, %v442_v8 }
  0xfd   :  { %1154 = vst.msk [vmem:[%s2688_s6 + $0x88] sm:$0xff] %vm1136_vm2, %v903_v9  ;;  %v1502_v14 = vpop.f32.mrb[18].mxu0 }
  0xfe   :  { %692 = vst.msk [vmem:[%s2687_s5 + $0x80] sm:$0xff] %vm675_vm1, %v437_v12  ;;  %v1600_v15 = vpop.f32.mrb[18].mxu1  ;;  %v452_v16 = vadd.f32 %v1502_v14, %v2035_v2  ;;  %v446_v18 = vpop.f32.mrb[19].mxu0 }
  0xff   :  { %1153 = vst.msk [vmem:[%s2688_s6 + $0x80] sm:$0xff] %vm1136_vm2, %v898_v13  ;;  %v913_v17 = vadd.f32 %v1600_v15, %v2040_v3  ;;  %v907_v19 = vpop.f32.mrb[19].mxu1  ;;  %v447_v20 = vadd.f32 %v2035_v2, %v446_v18 }
 0x100   :  { %v908_v21 = vadd.f32 %v2040_v3, %v907_v19  ;;  %695 = vst.msk [vmem:[%s2687_s5 + $0x98] sm:$0xff] %vm675_vm1, %v452_v16 }
 0x101   :  { %1156 = vst.msk [vmem:[%s2688_s6 + $0x98] sm:$0xff] %vm1136_vm2, %v913_v17  ;;  %v1505_v22 = vpop.f32.mrb[20].mxu0 }
 0x102   :  { %694 = vst.msk [vmem:[%s2687_s5 + $0x90] sm:$0xff] %vm675_vm1, %v447_v20  ;;  %v1603_v23 = vpop.f32.mrb[20].mxu1  ;;  %v462_v24 = vadd.f32 %v1505_v22, %v2035_v2  ;;  %v456_v26 = vpop.f32.mrb[21].mxu0 }
 0x103   :  { %1155 = vst.msk [vmem:[%s2688_s6 + $0x90] sm:$0xff] %vm1136_vm2, %v908_v21  ;;  %v923_v25 = vadd.f32 %v1603_v23, %v2040_v3  ;;  %v917_v27 = vpop.f32.mrb[21].mxu1  ;;  %v457_v28 = vadd.f32 %v2035_v2, %v456_v26 }
 0x104   :  { %v918_v29 = vadd.f32 %v2040_v3, %v917_v27  ;;  %697 = vst.msk [vmem:[%s2687_s5 + $0xa8] sm:$0xff] %vm675_vm1, %v462_v24 }
 0x105   :  { %1158 = vst.msk [vmem:[%s2688_s6 + $0xa8] sm:$0xff] %vm1136_vm2, %v923_v25  ;;  %v1508_v30 = vpop.f32.mrb[22].mxu0 }
 0x106   :  { %696 = vst.msk [vmem:[%s2687_s5 + $0xa0] sm:$0xff] %vm675_vm1, %v457_v28  ;;  %v1606_v31 = vpop.f32.mrb[22].mxu1  ;;  %v472_v32 = vadd.f32 %v1508_v30, %v2035_v2  ;;  %v466_v34 = vpop.f32.mrb[23].mxu0 }
 0x107   :  { %1157 = vst.msk [vmem:[%s2688_s6 + $0xa0] sm:$0xff] %vm1136_vm2, %v918_v29  ;;  %v933_v33 = vadd.f32 %v1606_v31, %v2040_v3  ;;  %v927_v35 = vpop.f32.mrb[23].mxu1  ;;  %v467_v36 = vadd.f32 %v2035_v2, %v466_v34 }
 0x108   :  { %v928_v37 = vadd.f32 %v2040_v3, %v927_v35  ;;  %699 = vst.msk [vmem:[%s2687_s5 + $0xb8] sm:$0xff] %vm675_vm1, %v472_v32 }
 0x109   :  { %1160 = vst.msk [vmem:[%s2688_s6 + $0xb8] sm:$0xff] %vm1136_vm2, %v933_v33  ;;  %v1511_v38 = vpop.f32.mrb[24].mxu0 }
 0x10a   :  { %698 = vst.msk [vmem:[%s2687_s5 + $0xb0] sm:$0xff] %vm675_vm1, %v467_v36  ;;  %v1609_v39 = vpop.f32.mrb[24].mxu1  ;;  %v482_v40 = vadd.f32 %v1511_v38, %v2035_v2  ;;  %v476_v42 = vpop.f32.mrb[25].mxu0 }
 0x10b   :  { %1159 = vst.msk [vmem:[%s2688_s6 + $0xb0] sm:$0xff] %vm1136_vm2, %v928_v37  ;;  %v943_v41 = vadd.f32 %v1609_v39, %v2040_v3  ;;  %v937_v43 = vpop.f32.mrb[25].mxu1  ;;  %v477_v44 = vadd.f32 %v2035_v2, %v476_v42 }
 0x10c   :  { %v938_v45 = vadd.f32 %v2040_v3, %v937_v43  ;;  %701 = vst.msk [vmem:[%s2687_s5 + $0xc8] sm:$0xff] %vm675_vm1, %v482_v40 }
 0x10d   :  { %1162 = vst.msk [vmem:[%s2688_s6 + $0xc8] sm:$0xff] %vm1136_vm2, %v943_v41  ;;  %v1514_v46 = vpop.f32.mrb[26].mxu0 }
 0x10e   :  { %700 = vst.msk [vmem:[%s2687_s5 + $0xc0] sm:$0xff] %vm675_vm1, %v477_v44  ;;  %v1612_v47 = vpop.f32.mrb[26].mxu1  ;;  %v492_v48 = vadd.f32 %v1514_v46, %v2035_v2  ;;  %v486_v50 = vpop.f32.mrb[27].mxu0 }
 0x10f   :  { %1161 = vst.msk [vmem:[%s2688_s6 + $0xc0] sm:$0xff] %vm1136_vm2, %v938_v45  ;;  %v953_v49 = vadd.f32 %v1612_v47, %v2040_v3  ;;  %v947_v51 = vpop.f32.mrb[27].mxu1  ;;  %v487_v52 = vadd.f32 %v2035_v2, %v486_v50 }
 0x110   :  { %v948_v53 = vadd.f32 %v2040_v3, %v947_v51  ;;  %703 = vst.msk [vmem:[%s2687_s5 + $0xd8] sm:$0xff] %vm675_vm1, %v492_v48 }
 0x111   :  { %1164 = vst.msk [vmem:[%s2688_s6 + $0xd8] sm:$0xff] %vm1136_vm2, %v953_v49  ;;  %v1517_v54 = vpop.f32.mrb[28].mxu0 }
 0x112   :  { %702 = vst.msk [vmem:[%s2687_s5 + $0xd0] sm:$0xff] %vm675_vm1, %v487_v52  ;;  %v1615_v55 = vpop.f32.mrb[28].mxu1  ;;  %v502_v56 = vadd.f32 %v1517_v54, %v2035_v2  ;;  %v496_v58 = vpop.f32.mrb[29].mxu0 }
 0x113   :  { %1163 = vst.msk [vmem:[%s2688_s6 + $0xd0] sm:$0xff] %vm1136_vm2, %v948_v53  ;;  %v963_v57 = vadd.f32 %v1615_v55, %v2040_v3  ;;  %v957_v59 = vpop.f32.mrb[29].mxu1  ;;  %v497_v60 = vadd.f32 %v2035_v2, %v496_v58 }
 0x114   :  { %v958_v61 = vadd.f32 %v2040_v3, %v957_v59  ;;  %705 = vst.msk [vmem:[%s2687_s5 + $0xe8] sm:$0xff] %vm675_vm1, %v502_v56 }
 0x115   :  { %1166 = vst.msk [vmem:[%s2688_s6 + $0xe8] sm:$0xff] %vm1136_vm2, %v963_v57  ;;  %v1520_v62 = vpop.f32.mrb[30].mxu0 }
 0x116   :  { %704 = vst.msk [vmem:[%s2687_s5 + $0xe0] sm:$0xff] %vm675_vm1, %v497_v60  ;;  %v1618_v63 = vpop.f32.mrb[30].mxu1  ;;  %v512_v0 = vadd.f32 %v1520_v62, %v2035_v2  ;;  %v506_v4 = vpop.f32.mrb[31].mxu0 }
 0x117   :  { %1165 = vst.msk [vmem:[%s2688_s6 + $0xe0] sm:$0xff] %vm1136_vm2, %v958_v61  ;;  %v973_v1 = vadd.f32 %v1618_v63, %v2040_v3  ;;  %v967_v5 = vpop.f32.mrb[31].mxu1  ;;  %v507_v6 = vadd.f32 %v2035_v2, %v506_v4 }
 0x118   :  { %v968_v7 = vadd.f32 %v2040_v3, %v967_v5  ;;  %707 = vst.msk [vmem:[%s2687_s5 + $0xf8] sm:$0xff] %vm675_vm1, %v512_v0 }
 0x119   :  { %1168 = vst.msk [vmem:[%s2688_s6 + $0xf8] sm:$0xff] %vm1136_vm2, %v973_v1  ;;  %v1523_v8 = vpop.f32.mrb[32].mxu0 }
 0x11a   :  { %706 = vst.msk [vmem:[%s2687_s5 + $0xf0] sm:$0xff] %vm675_vm1, %v507_v6  ;;  %v1621_v9 = vpop.f32.mrb[32].mxu1  ;;  %v522_v10 = vadd.f32 %v1523_v8, %v2035_v2  ;;  %v516_v12 = vpop.f32.mrb[33].mxu0 }
 0x11b   :  { %1167 = vst.msk [vmem:[%s2688_s6 + $0xf0] sm:$0xff] %vm1136_vm2, %v968_v7  ;;  %v983_v11 = vadd.f32 %v1621_v9, %v2040_v3  ;;  %v977_v13 = vpop.f32.mrb[33].mxu1  ;;  %v517_v14 = vadd.f32 %v2035_v2, %v516_v12 }
 0x11c   :  { %v978_v15 = vadd.f32 %v2040_v3, %v977_v13  ;;  %709 = vst.msk [vmem:[%s2687_s5 + $0x108] sm:$0xff] %vm675_vm1, %v522_v10 }
 0x11d   :  { %1170 = vst.msk [vmem:[%s2688_s6 + $0x108] sm:$0xff] %vm1136_vm2, %v983_v11  ;;  %v1526_v16 = vpop.f32.mrb[34].mxu0 }
 0x11e   :  { %708 = vst.msk [vmem:[%s2687_s5 + $0x100] sm:$0xff] %vm675_vm1, %v517_v14  ;;  %v1624_v17 = vpop.f32.mrb[34].mxu1  ;;  %v532_v18 = vadd.f32 %v1526_v16, %v2035_v2  ;;  %v526_v20 = vpop.f32.mrb[35].mxu0 }
 0x11f   :  { %1169 = vst.msk [vmem:[%s2688_s6 + $0x100] sm:$0xff] %vm1136_vm2, %v978_v15  ;;  %v993_v19 = vadd.f32 %v1624_v17, %v2040_v3  ;;  %v987_v21 = vpop.f32.mrb[35].mxu1  ;;  %v527_v22 = vadd.f32 %v2035_v2, %v526_v20 }
 0x120   :  { %v988_v23 = vadd.f32 %v2040_v3, %v987_v21  ;;  %711 = vst.msk [vmem:[%s2687_s5 + $0x118] sm:$0xff] %vm675_vm1, %v532_v18 }
 0x121   :  { %1172 = vst.msk [vmem:[%s2688_s6 + $0x118] sm:$0xff] %vm1136_vm2, %v993_v19  ;;  %v1529_v24 = vpop.f32.mrb[36].mxu0 }
 0x122   :  { %710 = vst.msk [vmem:[%s2687_s5 + $0x110] sm:$0xff] %vm675_vm1, %v527_v22  ;;  %v1627_v25 = vpop.f32.mrb[36].mxu1  ;;  %v542_v26 = vadd.f32 %v1529_v24, %v2035_v2  ;;  %v536_v28 = vpop.f32.mrb[37].mxu0 }
 0x123   :  { %1171 = vst.msk [vmem:[%s2688_s6 + $0x110] sm:$0xff] %vm1136_vm2, %v988_v23  ;;  %v1003_v27 = vadd.f32 %v1627_v25, %v2040_v3  ;;  %v997_v29 = vpop.f32.mrb[37].mxu1  ;;  %v537_v30 = vadd.f32 %v2035_v2, %v536_v28 }
 0x124   :  { %v998_v31 = vadd.f32 %v2040_v3, %v997_v29  ;;  %713 = vst.msk [vmem:[%s2687_s5 + $0x128] sm:$0xff] %vm675_vm1, %v542_v26 }
 0x125   :  { %1174 = vst.msk [vmem:[%s2688_s6 + $0x128] sm:$0xff] %vm1136_vm2, %v1003_v27  ;;  %v1532_v32 = vpop.f32.mrb[38].mxu0 }
 0x126   :  { %712 = vst.msk [vmem:[%s2687_s5 + $0x120] sm:$0xff] %vm675_vm1, %v537_v30  ;;  %v1630_v33 = vpop.f32.mrb[38].mxu1  ;;  %v552_v34 = vadd.f32 %v1532_v32, %v2035_v2  ;;  %v546_v36 = vpop.f32.mrb[39].mxu0 }
 0x127   :  { %1173 = vst.msk [vmem:[%s2688_s6 + $0x120] sm:$0xff] %vm1136_vm2, %v998_v31  ;;  %v1013_v35 = vadd.f32 %v1630_v33, %v2040_v3  ;;  %v1007_v37 = vpop.f32.mrb[39].mxu1  ;;  %v547_v38 = vadd.f32 %v2035_v2, %v546_v36 }
 0x128   :  { %v1008_v39 = vadd.f32 %v2040_v3, %v1007_v37  ;;  %715 = vst.msk [vmem:[%s2687_s5 + $0x138] sm:$0xff] %vm675_vm1, %v552_v34 }
 0x129   :  { %1176 = vst.msk [vmem:[%s2688_s6 + $0x138] sm:$0xff] %vm1136_vm2, %v1013_v35  ;;  %v1535_v40 = vpop.f32.mrb[40].mxu0 }
 0x12a   :  { %714 = vst.msk [vmem:[%s2687_s5 + $0x130] sm:$0xff] %vm675_vm1, %v547_v38  ;;  %v1633_v41 = vpop.f32.mrb[40].mxu1  ;;  %v562_v42 = vadd.f32 %v1535_v40, %v2035_v2  ;;  %v556_v44 = vpop.f32.mrb[41].mxu0 }
 0x12b   :  { %1175 = vst.msk [vmem:[%s2688_s6 + $0x130] sm:$0xff] %vm1136_vm2, %v1008_v39  ;;  %v1023_v43 = vadd.f32 %v1633_v41, %v2040_v3  ;;  %v1017_v45 = vpop.f32.mrb[41].mxu1  ;;  %v557_v46 = vadd.f32 %v2035_v2, %v556_v44 }
 0x12c   :  { %v1018_v47 = vadd.f32 %v2040_v3, %v1017_v45  ;;  %717 = vst.msk [vmem:[%s2687_s5 + $0x148] sm:$0xff] %vm675_vm1, %v562_v42 }
 0x12d   :  { %1178 = vst.msk [vmem:[%s2688_s6 + $0x148] sm:$0xff] %vm1136_vm2, %v1023_v43  ;;  %v1538_v48 = vpop.f32.mrb[42].mxu0 }
 0x12e   :  { %716 = vst.msk [vmem:[%s2687_s5 + $0x140] sm:$0xff] %vm675_vm1, %v557_v46  ;;  %v1636_v49 = vpop.f32.mrb[42].mxu1  ;;  %v572_v50 = vadd.f32 %v1538_v48, %v2035_v2  ;;  %v566_v52 = vpop.f32.mrb[43].mxu0 }
 0x12f   :  { %1177 = vst.msk [vmem:[%s2688_s6 + $0x140] sm:$0xff] %vm1136_vm2, %v1018_v47  ;;  %v1033_v51 = vadd.f32 %v1636_v49, %v2040_v3  ;;  %v1027_v53 = vpop.f32.mrb[43].mxu1  ;;  %v567_v54 = vadd.f32 %v2035_v2, %v566_v52 }
 0x130   :  { %v1028_v55 = vadd.f32 %v2040_v3, %v1027_v53  ;;  %719 = vst.msk [vmem:[%s2687_s5 + $0x158] sm:$0xff] %vm675_vm1, %v572_v50 }
 0x131   :  { %1180 = vst.msk [vmem:[%s2688_s6 + $0x158] sm:$0xff] %vm1136_vm2, %v1033_v51  ;;  %v1541_v56 = vpop.f32.mrb[44].mxu0 }
 0x132   :  { %718 = vst.msk [vmem:[%s2687_s5 + $0x150] sm:$0xff] %vm675_vm1, %v567_v54  ;;  %v1639_v57 = vpop.f32.mrb[44].mxu1  ;;  %v582_v58 = vadd.f32 %v1541_v56, %v2035_v2  ;;  %v576_v60 = vpop.f32.mrb[45].mxu0 }
 0x133   :  { %1179 = vst.msk [vmem:[%s2688_s6 + $0x150] sm:$0xff] %vm1136_vm2, %v1028_v55  ;;  %v1043_v59 = vadd.f32 %v1639_v57, %v2040_v3  ;;  %v1037_v61 = vpop.f32.mrb[45].mxu1  ;;  %v577_v62 = vadd.f32 %v2035_v2, %v576_v60 }
 0x134   :  { %v1038_v63 = vadd.f32 %v2040_v3, %v1037_v61  ;;  %721 = vst.msk [vmem:[%s2687_s5 + $0x168] sm:$0xff] %vm675_vm1, %v582_v58 }
 0x135   :  { %1182 = vst.msk [vmem:[%s2688_s6 + $0x168] sm:$0xff] %vm1136_vm2, %v1043_v59  ;;  %v1544_v0 = vpop.f32.mrb[46].mxu0 }
 0x136   :  { %720 = vst.msk [vmem:[%s2687_s5 + $0x160] sm:$0xff] %vm675_vm1, %v577_v62  ;;  %v1642_v1 = vpop.f32.mrb[46].mxu1  ;;  %v592_v4 = vadd.f32 %v1544_v0, %v2035_v2  ;;  %v586_v6 = vpop.f32.mrb[47].mxu0 }
 0x137   :  { %1181 = vst.msk [vmem:[%s2688_s6 + $0x160] sm:$0xff] %vm1136_vm2, %v1038_v63  ;;  %v1053_v5 = vadd.f32 %v1642_v1, %v2040_v3  ;;  %v1047_v7 = vpop.f32.mrb[47].mxu1  ;;  %v587_v8 = vadd.f32 %v2035_v2, %v586_v6 }
 0x138   :  { %v1048_v9 = vadd.f32 %v2040_v3, %v1047_v7  ;;  %723 = vst.msk [vmem:[%s2687_s5 + $0x178] sm:$0xff] %vm675_vm1, %v592_v4 }
 0x139   :  { %1184 = vst.msk [vmem:[%s2688_s6 + $0x178] sm:$0xff] %vm1136_vm2, %v1053_v5  ;;  %v1547_v10 = vpop.f32.mrb[48].mxu0 }
 0x13a   :  { %722 = vst.msk [vmem:[%s2687_s5 + $0x170] sm:$0xff] %vm675_vm1, %v587_v8  ;;  %v1645_v11 = vpop.f32.mrb[48].mxu1  ;;  %v602_v12 = vadd.f32 %v1547_v10, %v2035_v2  ;;  %v596_v14 = vpop.f32.mrb[49].mxu0 }
 0x13b   :  { %1183 = vst.msk [vmem:[%s2688_s6 + $0x170] sm:$0xff] %vm1136_vm2, %v1048_v9  ;;  %v1063_v13 = vadd.f32 %v1645_v11, %v2040_v3  ;;  %v1057_v15 = vpop.f32.mrb[49].mxu1  ;;  %v597_v16 = vadd.f32 %v2035_v2, %v596_v14 }
 0x13c   :  { %v1058_v17 = vadd.f32 %v2040_v3, %v1057_v15  ;;  %725 = vst.msk [vmem:[%s2687_s5 + $0x188] sm:$0xff] %vm675_vm1, %v602_v12 }
 0x13d   :  { %1186 = vst.msk [vmem:[%s2688_s6 + $0x188] sm:$0xff] %vm1136_vm2, %v1063_v13  ;;  %v1550_v18 = vpop.f32.mrb[50].mxu0 }
 0x13e   :  { %724 = vst.msk [vmem:[%s2687_s5 + $0x180] sm:$0xff] %vm675_vm1, %v597_v16  ;;  %v1648_v19 = vpop.f32.mrb[50].mxu1  ;;  %v612_v20 = vadd.f32 %v1550_v18, %v2035_v2  ;;  %v606_v22 = vpop.f32.mrb[51].mxu0 }
 0x13f   :  { %1185 = vst.msk [vmem:[%s2688_s6 + $0x180] sm:$0xff] %vm1136_vm2, %v1058_v17  ;;  %v1073_v21 = vadd.f32 %v1648_v19, %v2040_v3  ;;  %v1067_v23 = vpop.f32.mrb[51].mxu1  ;;  %v607_v24 = vadd.f32 %v2035_v2, %v606_v22 }
 0x140   :  { %v1068_v25 = vadd.f32 %v2040_v3, %v1067_v23  ;;  %727 = vst.msk [vmem:[%s2687_s5 + $0x198] sm:$0xff] %vm675_vm1, %v612_v20 }
 0x141   :  { %1188 = vst.msk [vmem:[%s2688_s6 + $0x198] sm:$0xff] %vm1136_vm2, %v1073_v21  ;;  %v1553_v26 = vpop.f32.mrb[52].mxu0 }
 0x142   :  { %726 = vst.msk [vmem:[%s2687_s5 + $0x190] sm:$0xff] %vm675_vm1, %v607_v24  ;;  %v1651_v27 = vpop.f32.mrb[52].mxu1  ;;  %v622_v28 = vadd.f32 %v1553_v26, %v2035_v2  ;;  %v616_v30 = vpop.f32.mrb[53].mxu0 }
 0x143   :  { %1187 = vst.msk [vmem:[%s2688_s6 + $0x190] sm:$0xff] %vm1136_vm2, %v1068_v25  ;;  %v1083_v29 = vadd.f32 %v1651_v27, %v2040_v3  ;;  %v1077_v31 = vpop.f32.mrb[53].mxu1  ;;  %v617_v32 = vadd.f32 %v2035_v2, %v616_v30 }
 0x144   :  { %v1078_v33 = vadd.f32 %v2040_v3, %v1077_v31  ;;  %729 = vst.msk [vmem:[%s2687_s5 + $0x1a8] sm:$0xff] %vm675_vm1, %v622_v28 }
 0x145   :  { %1190 = vst.msk [vmem:[%s2688_s6 + $0x1a8] sm:$0xff] %vm1136_vm2, %v1083_v29  ;;  %v1556_v34 = vpop.f32.mrb[54].mxu0 }
 0x146   :  { %728 = vst.msk [vmem:[%s2687_s5 + $0x1a0] sm:$0xff] %vm675_vm1, %v617_v32  ;;  %v1654_v35 = vpop.f32.mrb[54].mxu1  ;;  %v632_v36 = vadd.f32 %v1556_v34, %v2035_v2  ;;  %v626_v38 = vpop.f32.mrb[55].mxu0 }
 0x147   :  { %1189 = vst.msk [vmem:[%s2688_s6 + $0x1a0] sm:$0xff] %vm1136_vm2, %v1078_v33  ;;  %v1093_v37 = vadd.f32 %v1654_v35, %v2040_v3  ;;  %v1087_v39 = vpop.f32.mrb[55].mxu1  ;;  %v627_v40 = vadd.f32 %v2035_v2, %v626_v38 }
 0x148   :  { %v1088_v41 = vadd.f32 %v2040_v3, %v1087_v39  ;;  %731 = vst.msk [vmem:[%s2687_s5 + $0x1b8] sm:$0xff] %vm675_vm1, %v632_v36 }
 0x149   :  { %1192 = vst.msk [vmem:[%s2688_s6 + $0x1b8] sm:$0xff] %vm1136_vm2, %v1093_v37  ;;  %v1559_v42 = vpop.f32.mrb[56].mxu0 }
 0x14a   :  { %730 = vst.msk [vmem:[%s2687_s5 + $0x1b0] sm:$0xff] %vm675_vm1, %v627_v40  ;;  %v1657_v43 = vpop.f32.mrb[56].mxu1  ;;  %v642_v44 = vadd.f32 %v1559_v42, %v2035_v2  ;;  %v636_v46 = vpop.f32.mrb[57].mxu0 }
 0x14b   :  { %1191 = vst.msk [vmem:[%s2688_s6 + $0x1b0] sm:$0xff] %vm1136_vm2, %v1088_v41  ;;  %v1103_v45 = vadd.f32 %v1657_v43, %v2040_v3  ;;  %v1097_v47 = vpop.f32.mrb[57].mxu1  ;;  %v637_v48 = vadd.f32 %v2035_v2, %v636_v46 }
 0x14c   :  { %v1098_v49 = vadd.f32 %v2040_v3, %v1097_v47  ;;  %733 = vst.msk [vmem:[%s2687_s5 + $0x1c8] sm:$0xff] %vm675_vm1, %v642_v44 }
 0x14d   :  { %1194 = vst.msk [vmem:[%s2688_s6 + $0x1c8] sm:$0xff] %vm1136_vm2, %v1103_v45  ;;  %v1562_v50 = vpop.f32.mrb[58].mxu0 }
 0x14e   :  { %732 = vst.msk [vmem:[%s2687_s5 + $0x1c0] sm:$0xff] %vm675_vm1, %v637_v48  ;;  %v1660_v51 = vpop.f32.mrb[58].mxu1  ;;  %v652_v52 = vadd.f32 %v1562_v50, %v2035_v2  ;;  %v646_v54 = vpop.f32.mrb[59].mxu0 }
 0x14f   :  { %1193 = vst.msk [vmem:[%s2688_s6 + $0x1c0] sm:$0xff] %vm1136_vm2, %v1098_v49  ;;  %v1113_v53 = vadd.f32 %v1660_v51, %v2040_v3  ;;  %v1107_v55 = vpop.f32.mrb[59].mxu1  ;;  %v647_v56 = vadd.f32 %v2035_v2, %v646_v54 }
 0x150   :  { %v1108_v57 = vadd.f32 %v2040_v3, %v1107_v55  ;;  %735 = vst.msk [vmem:[%s2687_s5 + $0x1d8] sm:$0xff] %vm675_vm1, %v652_v52 }
 0x151   :  { %1196 = vst.msk [vmem:[%s2688_s6 + $0x1d8] sm:$0xff] %vm1136_vm2, %v1113_v53  ;;  %v1565_v58 = vpop.f32.mrb[60].mxu0 }
 0x152   :  { %734 = vst.msk [vmem:[%s2687_s5 + $0x1d0] sm:$0xff] %vm675_vm1, %v647_v56  ;;  %v1663_v59 = vpop.f32.mrb[60].mxu1  ;;  %v662_v60 = vadd.f32 %v1565_v58, %v2035_v2  ;;  %v656_v62 = vpop.f32.mrb[61].mxu0 }
 0x153   :  { %1195 = vst.msk [vmem:[%s2688_s6 + $0x1d0] sm:$0xff] %vm1136_vm2, %v1108_v57  ;;  %v1123_v61 = vadd.f32 %v1663_v59, %v2040_v3  ;;  %v1117_v63 = vpop.f32.mrb[61].mxu1  ;;  %v657_v0 = vadd.f32 %v2035_v2, %v656_v62 }
 0x154   :  { %v1118_v1 = vadd.f32 %v2040_v3, %v1117_v63  ;;  %737 = vst.msk [vmem:[%s2687_s5 + $0x1e8] sm:$0xff] %vm675_vm1, %v662_v60 }
 0x155   :  { %1198 = vst.msk [vmem:[%s2688_s6 + $0x1e8] sm:$0xff] %vm1136_vm2, %v1123_v61  ;;  %v1568_v4 = vpop.f32.mrb[62].mxu0 }
 0x156   :  { %736 = vst.msk [vmem:[%s2687_s5 + $0x1e0] sm:$0xff] %vm675_vm1, %v657_v0  ;;  %v1666_v5 = vpop.f32.mrb[62].mxu1  ;;  %v672_v6 = vadd.f32 %v1568_v4, %v2035_v2  ;;  %v666_v8 = vpop.f32.mrb[63].mxu0 }
 0x157   :  { %1197 = vst.msk [vmem:[%s2688_s6 + $0x1e0] sm:$0xff] %vm1136_vm2, %v1118_v1  ;;  %v1133_v7 = vadd.f32 %v1666_v5, %v2040_v3  ;;  %v1127_v9 = vpop.f32.mrb[63].mxu1  ;;  %v667_v10 = vadd.f32 %v2035_v2, %v666_v8 }
 0x158   :  { %v1128_v11 = vadd.f32 %v2040_v3, %v1127_v9  ;;  %739 = vst.msk [vmem:[%s2687_s5 + $0x1f8] sm:$0xff] %vm675_vm1, %v672_v6 }
 0x159   :  { %1200 = vst.msk [vmem:[%s2688_s6 + $0x1f8] sm:$0xff] %vm1136_vm2, %v1133_v7 }
 0x15a   :  { %738 = vst.msk [vmem:[%s2687_s5 + $0x1f0] sm:$0xff] %vm675_vm1, %v667_v10 }
 0x15b   :  { %1199 = vst.msk [vmem:[%s2688_s6 + $0x1f0] sm:$0xff] %vm1136_vm2, %v1128_v11 }

</bundles_post_ra>
